<compile_context>
chip_gen: v7x
topology: tpu7x:2x2x1
jax: 0.10.0
libtpu: 0.0.40
codegen_flags: <defaults>
</compile_context>

<pallas_src>
import jax
import jax.numpy as jnp
from jax.experimental import pallas as pl
from jax.experimental.pallas import tpu as pltpu

NUM_CLASS = 3               # forward() hard-codes labels 0, 1, 2
NUM_STATS = 3               # intersect, z_sum (softmax mass), y_sum (label mass)
SMOOTH = 1e-5               # forward() uses 1e-5, not self.smooth
LANES = 128
CHUNK_ROWS = 256            # in-kernel strip-mine granularity (multiple of 8 and 32)
MAX_TILE_ROWS_32BIT = 2048  # ~3 MiB pred block per grid step (f32)
MAX_TILE_ROWS_16BIT = 4096  # ~3 MiB pred block per grid step (bf16/f16)
OVERHEAD_ROWS = 256         # ~0.35us per-grid-step overhead expressed in "rows of HBM time"


def _choose_tile_rows(rows, max_tile, min_tiles=1):
    """Pick the per-grid-step row tile.

    rows <= 256: one full-extent tile (always a legal block, any alignment).
    rows  > 256: multiples of CHUNK_ROWS; minimize num_tiles*(overhead + tile_rows) so large
                 tiles are preferred without the old exact-divisor cliff (ragged last tile is
                 masked in-kernel). min_tiles>1 caps the tile so B==1 still yields >=2 tiles.
    """
    if rows <= CHUNK_ROWS:
        return rows
    hi = (rows // CHUNK_ROWS) * CHUNK_ROWS
    if min_tiles > 1:
        hi = min(hi, ((rows // min_tiles) // CHUNK_ROWS) * CHUNK_ROWS)
    hi = max(min(hi, max_tile), CHUNK_ROWS)
    best, best_cost = CHUNK_ROWS, None
    for tile in range(hi, CHUNK_ROWS - 1, -CHUNK_ROWS):   # descending: ties -> larger tile
        n = -(-rows // tile)
        cost = n * (OVERHEAD_ROWS + tile)
        if best_cost is None or cost < best_cost:
            best, best_cost = tile, cost
    return best


def _make_kernel(*, tile_rows, chunk_rows, acc_rows, n_chunks,
                 tiles_per_split, num_splits, num_valid_pix, needs_mask):
    C = NUM_CLASS

    def fold(x):
        # (chunk_rows, 128) -> (acc_rows, 128) partial sums (pure VPU vreg adds).
        if chunk_rows == acc_rows:
            return x
        return x.reshape(chunk_rows // acc_rows, acc_rows, LANES).sum(axis=0)

    def kernel(pred_ref, gt_ref, out_ref):
        # pred_ref: (C, tile_rows, 128)             caller dtype (cast to f32 per chunk)
        # gt_ref:   (tile_rows, 128)                int8 labels
        # out_ref:  (NUM_STATS*C, acc_rows, 128)    f32 VMEM-resident accumulator
        split_id = pl.program_id(1)
        t_id = pl.program_id(2)

        @pl.when(t_id == 0)
        def _init():
            out_ref[...] = jnp.zeros_like(out_ref)

        def process_chunk(ci, masked):
            if n_chunks == 1:
                pv = pred_ref[...].astype(jnp.float32)            # (C, CR, 128)
                gv = gt_ref[...].astype(jnp.int32)                # (CR, 128)
                row0 = 0
            else:
                row0 = pl.multiple_of(ci * chunk_rows, chunk_rows)
                pv = pred_ref[:, pl.ds(row0, chunk_rows), :].astype(jnp.float32)
                gv = gt_ref[pl.ds(row0, chunk_rows), :].astype(jnp.int32)

            if masked:
                # Only the globally-last tile runs this path: gate out lane padding and any
                # garbage rows past the end of the image (the block may extend OOB).
                row = jax.lax.broadcasted_iota(jnp.int32, (chunk_rows, LANES), 0)
                lane = jax.lax.broadcasted_iota(jnp.int32, (chunk_rows, LANES), 1)
                tile_idx = split_id * tiles_per_split + t_id
                pix = (tile_idx * tile_rows + row0 + row) * LANES + lane
                valid = pix < num_valid_pix
                validf = valid.astype(jnp.float32)
                pv = jnp.where(valid[None], pv, 0.0)   # OOB garbage -> finite softmax

            # Stable softmax across the tiny leading class axis: pure VPU max/sub/add.
            m = jnp.max(pv, axis=0, keepdims=True)     # (1, CR, 128)
            e = jnp.exp(pv - m)                        # (C, CR, 128)  EUP
            denom = jnp.sum(e, axis=0)                 # (CR, 128)
            inv = pl.reciprocal(denom, approx=True)    # EUP slot (off the VALU)
            inv = inv * (2.0 - denom * inv)            # one Newton step -> ~f32 accuracy

            for i in range(C):
                sm_i = e[i] * inv                          # softmax of class i
                lbl_i = (gv == i).astype(jnp.float32)
                if masked:
                    lbl_i = lbl_i * validf
                    z_i = sm_i * validf
                else:
                    z_i = sm_i
                out_ref[0 * C + i] += fold(sm_i * lbl_i)   # intersect_i
                out_ref[1 * C + i] += fold(z_i)            # z_sum_i
                out_ref[2 * C + i] += fold(lbl_i)          # y_sum_i

        def run_tile(masked):
            if n_chunks == 1:
                process_chunk(0, masked)
            else:
                def body(ci, carry):
                    process_chunk(ci, masked)
                    return carry
                jax.lax.fori_loop(0, n_chunks, body, 0)

        if not needs_mask:
            run_tile(False)
        else:
            is_ragged = jnp.logical_and(split_id == num_splits - 1,
                                        t_id == tiles_per_split - 1)

            @pl.when(jnp.logical_not(is_ragged))
            def _steady():
                run_tile(False)

            @pl.when(is_ragged)
            def _ragged():
                run_tile(True)

    return kernel


def spv_loss_forward(pred, gt):
    """Scalar soft-dice loss of spv_loss.forward().

    pred: (B, 3, H, W) float. Passing bf16 halves pred HBM traffic; arithmetic stays f32.
    gt:   (B, 1, H, W) or (B, H, W) integer-valued labels in {0, 1, 2}.
          Non-integral float labels are truncated toward zero before the `gt == i` compare
          (torch's exact float compare would match nothing for e.g. 0.5).
    """
    B, C, H, W = pred.shape
    assert C == NUM_CLASS, "spv_loss.forward hard-codes 3 classes (gt == 0, 1, 2)"
    S = H * W
    assert gt.shape[0] == B and gt.size == B * S

    gt_flat = gt.reshape(B, S)
    if gt_flat.dtype != jnp.int8:
        gt_flat = gt_flat.astype(jnp.int8)        # labels fit in int8 -> 4x less gt traffic
    pred_flat = pred.reshape(B, C, S)             # pure reshape, no HBM copy

    rows = (S + LANES - 1) // LANES
    lane_pad = rows * LANES - S
    if lane_pad:
        # Only when H*W % 128 != 0 (one extra HBM pass). Ragged ROW tiles never pad: they are
        # masked in-kernel instead.
        pred_flat = jnp.pad(pred_flat, ((0, 0), (0, 0), (0, lane_pad)))
        gt_flat = jnp.pad(gt_flat, ((0, 0), (0, lane_pad)), constant_values=NUM_CLASS)
    pred_r = pred_flat.reshape(B, C, rows, LANES)
    gt_r = gt_flat.reshape(B, rows, LANES)

    itemsize = jnp.dtype(pred.dtype).itemsize
    max_tile = MAX_TILE_ROWS_16BIT if itemsize <= 2 else MAX_TILE_ROWS_32BIT
    min_tiles = 2 if B == 1 else 1                # let both v7x TensorCores work at B == 1
    tile_rows = _choose_tile_rows(rows, max_tile, min_tiles)
    num_tiles = -(-rows // tile_rows)
    needs_mask = (num_tiles * tile_rows * LANES) != S

    num_splits = 2 if (B == 1 and num_tiles >= 2 and num_tiles % 2 == 0) else 1
    tiles_per_split = num_tiles // num_splits

    chunk_rows = min(tile_rows, CHUNK_ROWS)
    n_chunks = tile_rows // chunk_rows            # exact: tile_rows is rows (<=256) or k*256
    acc_rows = 8 if chunk_rows % 8 == 0 else chunk_rows

    kernel = _make_kernel(
        tile_rows=tile_rows, chunk_rows=chunk_rows, acc_rows=acc_rows,
        n_chunks=n_chunks, tiles_per_split=tiles_per_split,
        num_splits=num_splits, num_valid_pix=S, needs_mask=needs_mask)

    partials = pl.pallas_call(
        kernel,
        out_shape=jax.ShapeDtypeStruct(
            (B, num_splits, NUM_STATS * NUM_CLASS, acc_rows, LANES), jnp.float32),
        grid_spec=pltpu.PrefetchScalarGridSpec(
            num_scalar_prefetch=0,
            grid=(B, num_splits, tiles_per_split),
            in_specs=[
                pl.BlockSpec((None, NUM_CLASS, tile_rows, LANES),
                             lambda b, p, t: (b, 0, p * tiles_per_split + t, 0)),
                pl.BlockSpec((None, tile_rows, LANES),
                             lambda b, p, t: (b, p * tiles_per_split + t, 0)),
            ],
            out_specs=pl.BlockSpec(
                (None, None, NUM_STATS * NUM_CLASS, acc_rows, LANES),
                lambda b, p, t: (b, p, 0, 0, 0)),
        ),
        compiler_params=pltpu.CompilerParams(
            dimension_semantics=("parallel", "parallel", "arbitrary")),
    )(pred_r, gt_r)

    # Tiny final cross-lane / cross-batch reduce in plain JAX: (B, P, 9, acc, 128) -> (9,)
    sums = jnp.sum(partials, axis=(0, 1, 3, 4))
    intersect = sums[0:NUM_CLASS]
    z_sum = sums[NUM_CLASS:2 * NUM_CLASS]
    y_sum = sums[2 * NUM_CLASS:3 * NUM_CLASS]
    dice = (2.0 * intersect + SMOOTH) / (z_sum + y_sum + SMOOTH)
    return 1.0 - jnp.sum(dice) / NUM_CLASS


def spv_loss_ref(pred, gt):
    """Pure-JAX reference mirroring the PyTorch forward, for validation."""
    sm = jax.nn.softmax(pred.astype(jnp.float32), axis=1)      # (B, C, H, W)
    g = gt.reshape(gt.shape[0], pred.shape[2], pred.shape[3])  # (B, H, W)
    loss = 0.0
    for i in range(NUM_CLASS):
        lbl = (g == i).astype(jnp.float32)
        inter = jnp.sum(sm[:, i] * lbl)
        z = jnp.sum(sm[:, i])
        y = jnp.sum(lbl)
        loss += (2.0 * inter + SMOOTH) / (z + y + SMOOTH)
    return 1.0 - loss / NUM_CLASS


if __name__ == "__main__":
    key = jax.random.PRNGKey(0)
    kp, kg = jax.random.split(key)

    # Primary small case: H*W divisible by 128 -> fully unmasked fast path.
    B, C, H, W = 2, NUM_CLASS, 16, 16
    pred = jax.random.normal(kp, (B, C, H, W), dtype=jnp.float32)
    gt = jax.random.randint(kg, (B, 1, H, W), 0, NUM_CLASS).astype(jnp.int32)
    loss = jax.block_until_ready(spv_loss_forward(pred, gt))
    ref = jax.block_until_ready(spv_loss_ref(pred, gt))
    assert jnp.isfinite(loss)
    # EUP approx reciprocal + Newton step and per-lane partial-sum order -> compare at 1e-4.
    assert jnp.allclose(loss, ref, atol=1e-4, rtol=1e-4), (loss, ref)

    # Ragged small case: H*W % 128 != 0 -> exercises the masked last-tile path.
    B2, H2, W2 = 1, 20, 20
    pred2 = jax.random.normal(kp, (B2, NUM_CLASS, H2, W2), dtype=jnp.float32)
    gt2 = jax.random.randint(kg, (B2, 1, H2, W2), 0, NUM_CLASS).astype(jnp.int32)
    loss2 = jax.block_until_ready(spv_loss_forward(pred2, gt2))
    ref2 = jax.block_until_ready(spv_loss_ref(pred2, gt2))
    assert jnp.isfinite(loss2)
    assert jnp.allclose(loss2, ref2, atol=1e-4, rtol=1e-4), (loss2, ref2)

    print("KERNEL_OK")
</pallas_src>

<mosaic_0001>
module attributes {stable_mosaic.version = 11 : i64} {
  func.func @kernel(%arg0: i32, %arg1: i32, %arg2: i32, %arg3: memref<1x3x2x128xf32, #tpu.memory_space<vmem>>, %arg4: memref<1x2x128xi8, #tpu.memory_space<vmem>>, %arg5: memref<1x1x9x2x128xf32, #tpu.memory_space<vmem>>) attributes {dimension_semantics = [#tpu.dimension_semantics<parallel>, #tpu.dimension_semantics<parallel>, #tpu.dimension_semantics<arbitrary>], iteration_bounds = array<i64: 2, 1, 1>, scalar_prefetch = 0 : i64, scratch_operands = 0 : i64, tpu.core_type = #tpu.core_type<tc>, window_params = [{transform_indices = @transform_0, window_bounds = array<i64: 1, 3, 2, 128>}, {transform_indices = @transform_1, window_bounds = array<i64: 1, 2, 128>}, {transform_indices = @transform_2, window_bounds = array<i64: 1, 1, 9, 2, 128>}]} {
    %c0_i32 = arith.constant 0 : i32
    %0 = arith.cmpi eq, %arg2, %c0_i32 : i32
    %1 = arith.extui %0 : i1 to i32
    %c0_i32_0 = arith.constant 0 : i32
    %2 = arith.cmpi ne, %1, %c0_i32_0 : i32
    scf.if %2 {
      %cst_92 = arith.constant 0.000000e+00 : f32
      %97 = vector.broadcast %cst_92 : f32 to vector<9x2x128xf32>
      %c0_93 = arith.constant 0 : index
      %c0_94 = arith.constant 0 : index
      %c0_95 = arith.constant 0 : index
      %c0_96 = arith.constant 0 : index
      %c0_97 = arith.constant 0 : index
      %98 = vector.load %arg5[%c0_93, %c0_94, %c0_95, %c0_96, %c0_97] : memref<1x1x9x2x128xf32, #tpu.memory_space<vmem>>, vector<1x1x9x2x128xf32>
      %99 = vector.shape_cast %98 : vector<1x1x9x2x128xf32> to vector<9x2x128xf32>
      %100 = vector.shape_cast %97 : vector<9x2x128xf32> to vector<1x1x9x2x128xf32>
      tpu.vector_store %arg5[%c0_93, %c0_94, %c0_95, %c0_96, %c0_97], %100 {strides = array<i32>} : memref<1x1x9x2x128xf32, #tpu.memory_space<vmem>>, vector<1x1x9x2x128xf32>,
    } else {
    }
    %c0 = arith.constant 0 : index
    %c0_1 = arith.constant 0 : index
    %c0_2 = arith.constant 0 : index
    %c0_3 = arith.constant 0 : index
    %3 = vector.load %arg3[%c0, %c0_1, %c0_2, %c0_3] : memref<1x3x2x128xf32, #tpu.memory_space<vmem>>, vector<1x3x2x128xf32>
    %4 = vector.shape_cast %3 : vector<1x3x2x128xf32> to vector<3x2x128xf32>
    %c0_4 = arith.constant 0 : index
    %c0_5 = arith.constant 0 : index
    %c0_6 = arith.constant 0 : index
    %5 = vector.load %arg4[%c0_4, %c0_5, %c0_6] : memref<1x2x128xi8, #tpu.memory_space<vmem>>, vector<1x2x128xi8>
    %6 = vector.shape_cast %5 : vector<1x2x128xi8> to vector<2x128xi8>
    %7 = arith.extsi %6 : vector<2x128xi8> to vector<2x128xi32>
    %cst = arith.constant dense<0xFF800000> : vector<2x128xf32>
    %8 = vector.multi_reduction <maximumf>, %4, %cst [0] : vector<3x2x128xf32> to vector<2x128xf32>
    %9 = vector.shape_cast %8 : vector<2x128xf32> to vector<1x2x128xf32>
    %10 = vector.broadcast %9 : vector<1x2x128xf32> to vector<3x2x128xf32>
    %11 = arith.subf %4, %10 : vector<3x2x128xf32>
    %12 = math.exp %11 : vector<3x2x128xf32>
    %cst_7 = arith.constant dense<0.000000e+00> : vector<2x128xf32>
    %13 = vector.multi_reduction <add>, %12, %cst_7 [0] : vector<3x2x128xf32> to vector<2x128xf32>
    %14 = tpu.reciprocal %13 {approx = true} : vector<2x128xf32> -> vector<2x128xf32>
    %15 = arith.mulf %13, %14 : vector<2x128xf32>
    %cst_8 = arith.constant 2.000000e+00 : f32
    %16 = vector.broadcast %cst_8 : f32 to vector<2x128xf32>
    %17 = arith.subf %16, %15 : vector<2x128xf32>
    %18 = arith.mulf %14, %17 : vector<2x128xf32>
    %19 = vector.extract_strided_slice %12 {offsets = [0, 0, 0], sizes = [1, 2, 128], strides = [1, 1, 1]} : vector<3x2x128xf32> to vector<1x2x128xf32>
    %20 = vector.shape_cast %19 : vector<1x2x128xf32> to vector<2x128xf32>
    %21 = arith.mulf %20, %18 : vector<2x128xf32>
    %c0_i32_9 = arith.constant 0 : i32
    %22 = vector.broadcast %c0_i32_9 : i32 to vector<2x128xi32>
    %23 = arith.cmpi eq, %7, %22 : vector<2x128xi32>
    %24 = arith.extui %23 : vector<2x128xi1> to vector<2x128xi32>
    %25 = arith.sitofp %24 : vector<2x128xi32> to vector<2x128xf32>
    %c0_10 = arith.constant 0 : index
    %c0_11 = arith.constant 0 : index
    %c0_12 = arith.constant 0 : index
    %c0_13 = arith.constant 0 : index
    %c0_14 = arith.constant 0 : index
    %26 = vector.load %arg5[%c0_10, %c0_11, %c0_12, %c0_13, %c0_14] : memref<1x1x9x2x128xf32, #tpu.memory_space<vmem>>, vector<1x1x1x2x128xf32>
    %27 = vector.shape_cast %26 : vector<1x1x1x2x128xf32> to vector<2x128xf32>
    %28 = arith.mulf %21, %25 : vector<2x128xf32>
    %29 = arith.addf %27, %28 : vector<2x128xf32>
    %c0_15 = arith.constant 0 : index
    %c0_16 = arith.constant 0 : index
    %c0_17 = arith.constant 0 : index
    %c0_18 = arith.constant 0 : index
    %c0_19 = arith.constant 0 : index
    %30 = vector.load %arg5[%c0_15, %c0_16, %c0_17, %c0_18, %c0_19] : memref<1x1x9x2x128xf32, #tpu.memory_space<vmem>>, vector<1x1x1x2x128xf32>
    %31 = vector.shape_cast %30 : vector<1x1x1x2x128xf32> to vector<2x128xf32>
    %32 = vector.shape_cast %29 : vector<2x128xf32> to vector<1x1x1x2x128xf32>
    tpu.vector_store %arg5[%c0_15, %c0_16, %c0_17, %c0_18, %c0_19], %32 {strides = array<i32>} : memref<1x1x9x2x128xf32, #tpu.memory_space<vmem>>, vector<1x1x1x2x128xf32>,
    %c0_20 = arith.constant 0 : index
    %c0_21 = arith.constant 0 : index
    %c3 = arith.constant 3 : index
    %c0_22 = arith.constant 0 : index
    %c0_23 = arith.constant 0 : index
    %33 = vector.load %arg5[%c0_20, %c0_21, %c3, %c0_22, %c0_23] : memref<1x1x9x2x128xf32, #tpu.memory_space<vmem>>, vector<1x1x1x2x128xf32>
    %34 = vector.shape_cast %33 : vector<1x1x1x2x128xf32> to vector<2x128xf32>
    %35 = arith.addf %34, %21 : vector<2x128xf32>
    %c0_24 = arith.constant 0 : index
    %c0_25 = arith.constant 0 : index
    %c3_26 = arith.constant 3 : index
    %c0_27 = arith.constant 0 : index
    %c0_28 = arith.constant 0 : index
    %36 = vector.load %arg5[%c0_24, %c0_25, %c3_26, %c0_27, %c0_28] : memref<1x1x9x2x128xf32, #tpu.memory_space<vmem>>, vector<1x1x1x2x128xf32>
    %37 = vector.shape_cast %36 : vector<1x1x1x2x128xf32> to vector<2x128xf32>
    %38 = vector.shape_cast %35 : vector<2x128xf32> to vector<1x1x1x2x128xf32>
    tpu.vector_store %arg5[%c0_24, %c0_25, %c3_26, %c0_27, %c0_28], %38 {strides = array<i32>} : memref<1x1x9x2x128xf32, #tpu.memory_space<vmem>>, vector<1x1x1x2x128xf32>,
    %c0_29 = arith.constant 0 : index
    %c0_30 = arith.constant 0 : index
    %c6 = arith.constant 6 : index
    %c0_31 = arith.constant 0 : index
    %c0_32 = arith.constant 0 : index
    %39 = vector.load %arg5[%c0_29, %c0_30, %c6, %c0_31, %c0_32] : memref<1x1x9x2x128xf32, #tpu.memory_space<vmem>>, vector<1x1x1x2x128xf32>
    %40 = vector.shape_cast %39 : vector<1x1x1x2x128xf32> to vector<2x128xf32>
    %41 = arith.addf %40, %25 : vector<2x128xf32>
    %c0_33 = arith.constant 0 : index
    %c0_34 = arith.constant 0 : index
    %c6_35 = arith.constant 6 : index
    %c0_36 = arith.constant 0 : index
    %c0_37 = arith.constant 0 : index
    %42 = vector.load %arg5[%c0_33, %c0_34, %c6_35, %c0_36, %c0_37] : memref<1x1x9x2x128xf32, #tpu.memory_space<vmem>>, vector<1x1x1x2x128xf32>
    %43 = vector.shape_cast %42 : vector<1x1x1x2x128xf32> to vector<2x128xf32>
    %44 = vector.shape_cast %41 : vector<2x128xf32> to vector<1x1x1x2x128xf32>
    tpu.vector_store %arg5[%c0_33, %c0_34, %c6_35, %c0_36, %c0_37], %44 {strides = array<i32>} : memref<1x1x9x2x128xf32, #tpu.memory_space<vmem>>, vector<1x1x1x2x128xf32>,
    %45 = vector.extract_strided_slice %12 {offsets = [1, 0, 0], sizes = [1, 2, 128], strides = [1, 1, 1]} : vector<3x2x128xf32> to vector<1x2x128xf32>
    %46 = vector.shape_cast %45 : vector<1x2x128xf32> to vector<2x128xf32>
    %47 = arith.mulf %46, %18 : vector<2x128xf32>
    %c1_i32 = arith.constant 1 : i32
    %48 = vector.broadcast %c1_i32 : i32 to vector<2x128xi32>
    %49 = arith.cmpi eq, %7, %48 : vector<2x128xi32>
    %50 = arith.extui %49 : vector<2x128xi1> to vector<2x128xi32>
    %51 = arith.sitofp %50 : vector<2x128xi32> to vector<2x128xf32>
    %c0_38 = arith.constant 0 : index
    %c0_39 = arith.constant 0 : index
    %c1 = arith.constant 1 : index
    %c0_40 = arith.constant 0 : index
    %c0_41 = arith.constant 0 : index
    %52 = vector.load %arg5[%c0_38, %c0_39, %c1, %c0_40, %c0_41] : memref<1x1x9x2x128xf32, #tpu.memory_space<vmem>>, vector<1x1x1x2x128xf32>
    %53 = vector.shape_cast %52 : vector<1x1x1x2x128xf32> to vector<2x128xf32>
    %54 = arith.mulf %47, %51 : vector<2x128xf32>
    %55 = arith.addf %53, %54 : vector<2x128xf32>
    %c0_42 = arith.constant 0 : index
    %c0_43 = arith.constant 0 : index
    %c1_44 = arith.constant 1 : index
    %c0_45 = arith.constant 0 : index
    %c0_46 = arith.constant 0 : index
    %56 = vector.load %arg5[%c0_42, %c0_43, %c1_44, %c0_45, %c0_46] : memref<1x1x9x2x128xf32, #tpu.memory_space<vmem>>, vector<1x1x1x2x128xf32>
    %57 = vector.shape_cast %56 : vector<1x1x1x2x128xf32> to vector<2x128xf32>
    %58 = vector.shape_cast %55 : vector<2x128xf32> to vector<1x1x1x2x128xf32>
    tpu.vector_store %arg5[%c0_42, %c0_43, %c1_44, %c0_45, %c0_46], %58 {strides = array<i32>} : memref<1x1x9x2x128xf32, #tpu.memory_space<vmem>>, vector<1x1x1x2x128xf32>,
    %c0_47 = arith.constant 0 : index
    %c0_48 = arith.constant 0 : index
    %c4 = arith.constant 4 : index
    %c0_49 = arith.constant 0 : index
    %c0_50 = arith.constant 0 : index
    %59 = vector.load %arg5[%c0_47, %c0_48, %c4, %c0_49, %c0_50] : memref<1x1x9x2x128xf32, #tpu.memory_space<vmem>>, vector<1x1x1x2x128xf32>
    %60 = vector.shape_cast %59 : vector<1x1x1x2x128xf32> to vector<2x128xf32>
    %61 = arith.addf %60, %47 : vector<2x128xf32>
    %c0_51 = arith.constant 0 : index
    %c0_52 = arith.constant 0 : index
    %c4_53 = arith.constant 4 : index
    %c0_54 = arith.constant 0 : index
    %c0_55 = arith.constant 0 : index
    %62 = vector.load %arg5[%c0_51, %c0_52, %c4_53, %c0_54, %c0_55] : memref<1x1x9x2x128xf32, #tpu.memory_space<vmem>>, vector<1x1x1x2x128xf32>
    %63 = vector.shape_cast %62 : vector<1x1x1x2x128xf32> to vector<2x128xf32>
    %64 = vector.shape_cast %61 : vector<2x128xf32> to vector<1x1x1x2x128xf32>
    tpu.vector_store %arg5[%c0_51, %c0_52, %c4_53, %c0_54, %c0_55], %64 {strides = array<i32>} : memref<1x1x9x2x128xf32, #tpu.memory_space<vmem>>, vector<1x1x1x2x128xf32>,
    %c0_56 = arith.constant 0 : index
    %c0_57 = arith.constant 0 : index
    %c7 = arith.constant 7 : index
    %c0_58 = arith.constant 0 : index
    %c0_59 = arith.constant 0 : index
    %65 = vector.load %arg5[%c0_56, %c0_57, %c7, %c0_58, %c0_59] : memref<1x1x9x2x128xf32, #tpu.memory_space<vmem>>, vector<1x1x1x2x128xf32>
    %66 = vector.shape_cast %65 : vector<1x1x1x2x128xf32> to vector<2x128xf32>
    %67 = arith.addf %66, %51 : vector<2x128xf32>
    %c0_60 = arith.constant 0 : index
    %c0_61 = arith.constant 0 : index
    %c7_62 = arith.constant 7 : index
    %c0_63 = arith.constant 0 : index
    %c0_64 = arith.constant 0 : index
    %68 = vector.load %arg5[%c0_60, %c0_61, %c7_62, %c0_63, %c0_64] : memref<1x1x9x2x128xf32, #tpu.memory_space<vmem>>, vector<1x1x1x2x128xf32>
    %69 = vector.shape_cast %68 : vector<1x1x1x2x128xf32> to vector<2x128xf32>
    %70 = vector.shape_cast %67 : vector<2x128xf32> to vector<1x1x1x2x128xf32>
    tpu.vector_store %arg5[%c0_60, %c0_61, %c7_62, %c0_63, %c0_64], %70 {strides = array<i32>} : memref<1x1x9x2x128xf32, #tpu.memory_space<vmem>>, vector<1x1x1x2x128xf32>,
    %71 = vector.extract_strided_slice %12 {offsets = [2, 0, 0], sizes = [1, 2, 128], strides = [1, 1, 1]} : vector<3x2x128xf32> to vector<1x2x128xf32>
    %72 = vector.shape_cast %71 : vector<1x2x128xf32> to vector<2x128xf32>
    %73 = arith.mulf %72, %18 : vector<2x128xf32>
    %c2_i32 = arith.constant 2 : i32
    %74 = vector.broadcast %c2_i32 : i32 to vector<2x128xi32>
    %75 = arith.cmpi eq, %7, %74 : vector<2x128xi32>
    %76 = arith.extui %75 : vector<2x128xi1> to vector<2x128xi32>
    %77 = arith.sitofp %76 : vector<2x128xi32> to vector<2x128xf32>
    %c0_65 = arith.constant 0 : index
    %c0_66 = arith.constant 0 : index
    %c2 = arith.constant 2 : index
    %c0_67 = arith.constant 0 : index
    %c0_68 = arith.constant 0 : index
    %78 = vector.load %arg5[%c0_65, %c0_66, %c2, %c0_67, %c0_68] : memref<1x1x9x2x128xf32, #tpu.memory_space<vmem>>, vector<1x1x1x2x128xf32>
    %79 = vector.shape_cast %78 : vector<1x1x1x2x128xf32> to vector<2x128xf32>
    %80 = arith.mulf %73, %77 : vector<2x128xf32>
    %81 = arith.addf %79, %80 : vector<2x128xf32>
    %c0_69 = arith.constant 0 : index
    %c0_70 = arith.constant 0 : index
    %c2_71 = arith.constant 2 : index
    %c0_72 = arith.constant 0 : index
    %c0_73 = arith.constant 0 : index
    %82 = vector.load %arg5[%c0_69, %c0_70, %c2_71, %c0_72, %c0_73] : memref<1x1x9x2x128xf32, #tpu.memory_space<vmem>>, vector<1x1x1x2x128xf32>
    %83 = vector.shape_cast %82 : vector<1x1x1x2x128xf32> to vector<2x128xf32>
    %84 = vector.shape_cast %81 : vector<2x128xf32> to vector<1x1x1x2x128xf32>
    tpu.vector_store %arg5[%c0_69, %c0_70, %c2_71, %c0_72, %c0_73], %84 {strides = array<i32>} : memref<1x1x9x2x128xf32, #tpu.memory_space<vmem>>, vector<1x1x1x2x128xf32>,
    %c0_74 = arith.constant 0 : index
    %c0_75 = arith.constant 0 : index
    %c5 = arith.constant 5 : index
    %c0_76 = arith.constant 0 : index
    %c0_77 = arith.constant 0 : index
    %85 = vector.load %arg5[%c0_74, %c0_75, %c5, %c0_76, %c0_77] : memref<1x1x9x2x128xf32, #tpu.memory_space<vmem>>, vector<1x1x1x2x128xf32>
    %86 = vector.shape_cast %85 : vector<1x1x1x2x128xf32> to vector<2x128xf32>
    %87 = arith.addf %86, %73 : vector<2x128xf32>
    %c0_78 = arith.constant 0 : index
    %c0_79 = arith.constant 0 : index
    %c5_80 = arith.constant 5 : index
    %c0_81 = arith.constant 0 : index
    %c0_82 = arith.constant 0 : index
    %88 = vector.load %arg5[%c0_78, %c0_79, %c5_80, %c0_81, %c0_82] : memref<1x1x9x2x128xf32, #tpu.memory_space<vmem>>, vector<1x1x1x2x128xf32>
    %89 = vector.shape_cast %88 : vector<1x1x1x2x128xf32> to vector<2x128xf32>
    %90 = vector.shape_cast %87 : vector<2x128xf32> to vector<1x1x1x2x128xf32>
    tpu.vector_store %arg5[%c0_78, %c0_79, %c5_80, %c0_81, %c0_82], %90 {strides = array<i32>} : memref<1x1x9x2x128xf32, #tpu.memory_space<vmem>>, vector<1x1x1x2x128xf32>,
    %c0_83 = arith.constant 0 : index
    %c0_84 = arith.constant 0 : index
    %c8 = arith.constant 8 : index
    %c0_85 = arith.constant 0 : index
    %c0_86 = arith.constant 0 : index
    %91 = vector.load %arg5[%c0_83, %c0_84, %c8, %c0_85, %c0_86] : memref<1x1x9x2x128xf32, #tpu.memory_space<vmem>>, vector<1x1x1x2x128xf32>
    %92 = vector.shape_cast %91 : vector<1x1x1x2x128xf32> to vector<2x128xf32>
    %93 = arith.addf %92, %77 : vector<2x128xf32>
    %c0_87 = arith.constant 0 : index
    %c0_88 = arith.constant 0 : index
    %c8_89 = arith.constant 8 : index
    %c0_90 = arith.constant 0 : index
    %c0_91 = arith.constant 0 : index
    %94 = vector.load %arg5[%c0_87, %c0_88, %c8_89, %c0_90, %c0_91] : memref<1x1x9x2x128xf32, #tpu.memory_space<vmem>>, vector<1x1x1x2x128xf32>
    %95 = vector.shape_cast %94 : vector<1x1x1x2x128xf32> to vector<2x128xf32>
    %96 = vector.shape_cast %93 : vector<2x128xf32> to vector<1x1x1x2x128xf32>
    tpu.vector_store %arg5[%c0_87, %c0_88, %c8_89, %c0_90, %c0_91], %96 {strides = array<i32>} : memref<1x1x9x2x128xf32, #tpu.memory_space<vmem>>, vector<1x1x1x2x128xf32>,
    return
  }
  func.func @transform_0(%arg0: i32, %arg1: i32, %arg2: i32) -> (i32, i32, i32, i32) {
    %c1_i32 = arith.constant 1 : i32
    %0 = arith.muli %arg1, %c1_i32 : i32
    %1 = arith.addi %0, %arg2 : i32
    %c0_i32 = arith.constant 0 : i32
    %c0_i32_0 = arith.constant 0 : i32
    %c0_i32_1 = arith.constant 0 : i32
    return %arg0, %c0_i32, %1, %c0_i32_0 : i32, i32, i32, i32
  }
  func.func @transform_1(%arg0: i32, %arg1: i32, %arg2: i32) -> (i32, i32, i32) {
    %c1_i32 = arith.constant 1 : i32
    %0 = arith.muli %arg1, %c1_i32 : i32
    %1 = arith.addi %0, %arg2 : i32
    %c0_i32 = arith.constant 0 : i32
    %c0_i32_0 = arith.constant 0 : i32
    return %arg0, %1, %c0_i32 : i32, i32, i32
  }
  func.func @transform_2(%arg0: i32, %arg1: i32, %arg2: i32) -> (i32, i32, i32, i32, i32) {
    %c0_i32 = arith.constant 0 : i32
    %c0_i32_0 = arith.constant 0 : i32
    %c0_i32_1 = arith.constant 0 : i32
    %c0_i32_2 = arith.constant 0 : i32
    return %arg0, %arg1, %c0_i32, %c0_i32_0, %c0_i32_1 : i32, i32, i32, i32, i32
  }
}

</mosaic_0001>

<bundles_post_ra>
// kernel: tpu_custom_call.1
= control target key start
LH: loop header
LB: loop body
LE: loop exit
PB: predicated region body
PF: predicated region fallthrough
CT: control target
= control target key end

     0   :  { %7 = vsyncpa [#allocation3], 0  ;;  %s893_s0 = inlined_call_operand.hbm [shape: f32[2,3,2,128], index: 0, kind: input, shape index: {}]   ;;  %s894_s1 = inlined_call_operand.vmem [shape: s8[2,2,128], index: 1, kind: input, shape index: {}]   ;;  %s895_s2 = inlined_call_operand.hbm [shape: f32[2,1,9,2,128], index: 2, kind: output, shape index: {}]  }
   0x1   :  { %9 = vsyncpa [#allocation3 + $0x1], 0 }
   0x2   :  { %10 = vsyncpa [#allocation4], 0 }
   0x3   :  { %12 = vsyncpa [#allocation4 + $0x1], 0  ;;  %s676_s9 = smov 0   ;;  %s678_s10 = smov 0  }
   0x4   :  { %s680_s11 = smov 0   ;;  %s682_s12 = smov 0  }
   0x5   :  { %s684_s13 = smov 0   ;;  %s686_s14 = smov 0  }
   0x6 LB: > { %s432_s15 = sadd.s32 4294967295, %s652_s14   ;;  %s433_s16 = sadd.s32 4294967294, %s652_s14   ;;  %s652_s14 = sphi %s686_s14, %s18_s14   ;;  %s648_s13 = sphi %s684_s13, %s910_s13   ;;  %s644_s12 = sphi %s682_s12, %s909_s12   ;;  %s640_s11 = sphi %s680_s11, %s908_s11   ;;  %s636_s10 = sphi %s678_s10, %s907_s10   ;;  %s632_s9 = sphi %s676_s9, %s906_s9  }
   0x7   : > { %s37_s17 = sadd.s32 1, %s648_s13  ;;  %s48_s18 = sadd.s32 1, %s640_s11 }
   0x8   : > { %p39_p0 = scmp.ge.s32.totalorder %s37_s17, 2  ;;  %p55_p1 = scmp.ne.s32.totalorder %s640_s11, %s636_s10 }
   0x9   : > { %p56_p2 = scmp.eq.s32.totalorder %s652_s14, 0  ;;  %p61_p3 = scmp.ne.s32.totalorder %s636_s10, %s632_s9 }
   0xa   : > { %s912_s17 = smov (%p39_p0, %s37_s17), 0  ;;  %p62_p5 = scmp.eq.s32.totalorder %s432_s15, 0 }
   0xb   : > { %p717_p4 = por %p56_p2, %p55_p1  ;;  %s43_s20 = ssub.s32 %s648_s13, %s912_s17 }
   0xc   : > { %p117_p6 = scmp.eq.s32.totalorder %s432_s15, 1  ;;  %p46_p7 = scmp.eq.s32.totalorder %s43_s20, 0 }
   0xd   : > { %p723_p8 = por %p62_p5, %p61_p3  ;;  %p123_p10 = scmp.eq.s32.totalorder %s433_s16, 1 }
   0xe   : > { %p727_p9 = por %p117_p6, %p55_p1  ;;  %p477_p13 = scmp.lt.s32.totalorder %s652_s14, 2 }
   0xf   : > { %s732_s23 = scalar_select %p46_p7, %s640_s11, %s48_s18  }
  0x10   : > { %s899_s22 = scalar_select %p727_p9, 1, 0 }
  0x11   : > { %p734_p11 = por %p123_p10, %p61_p3  ;;  %s143_s25 = sand.u32 1, %s640_s11  }
  0x12   : > { %s460_s26 = smul.u32 6, %s143_s25  ;;  %p744_p0 = pnand %p477_p13, %p717_p4 }
  0x13   : > { %s900_s24 = scalar_select %p734_p11, 1, 0 }
  0x14   : > { %s461_s27 = smul.u32 96, %s648_s13  ;;  %s147_s4 = scalar_lea.vmem [#allocation2], %s460_s26 }
  0x15   : > { %s156_s5 = sshll.u32 %s147_s4, 4  ;;  %s756_s6 = scalar_lea.sflag [#allocation3], %s143_s25  ;;  %s753_s5 = int_to_ptr.vmem [resolvable:$true] %s156_s5 }
  0x16   : > { %s751_s3 = scalar_lea.hbm %s893_s0, %s461_s27  ;;  %p542_p3 = pneg %p744_p0 }
  0x17   : > { %s540_s7 = scalar_lea.hbm %s751_s3, 96  ;;  %s545_s16 = scalar_lea.hbm %s893_s0, 192 }
  0x18   : > { %p541_p2 = scmp.ne.s32.totalorder %s751_s3, %s540_s7  ;;  %p546_p6 = scmp.lt.u32.totalorder %s751_s3, %s893_s0 }
  0x19   : > { %p547_p7 = scmp.lt.u32.totalorder %s545_s16, %s540_s7  ;;  %p549_p13 = scmp.lt.u32.totalorder %s540_s7, %s751_s3 }
  0x1a   : > { %p543_p4 = pnand %p542_p3, %p541_p2 }
  0x1b   : > { %p548_p10 = por %p547_p7, %p546_p6 }
  0x1c   : > { %p544_p5 = pneg %p543_p4 }
  0x1d   : > { %p550_p12 = por %p549_p13, %p548_p10 }
  0x1f   : > { %p551_p1 = pnand %p550_p12, %p544_p5 }
  0x21   : > { %554 = shalt.err (!%p551_p1)
}
  0x22   : > { %s555_s20 = scalar_lea.vmem %s753_s5, 96  ;;  %s654_s25 = smov [#allocation2]  }
  0x23   : > { %p556_p2 = scmp.ne.s32.totalorder %s753_s5, %s555_s20  ;;  %s560_s26 = sshll.u32 %s654_s25, 4  ;;  %s561_s26 = int_to_ptr.vmem [resolvable:$false] %s560_s26 }
  0x24   : > { %s562_s27 = scalar_lea.vmem %s561_s26, 192  ;;  %p563_p9 = scmp.lt.s32.totalorder %s753_s5, %s561_s26 }
  0x25   : > { %p558_p4 = pnand %p556_p2, %p542_p3  ;;  %p564_p6 = scmp.lt.s32.totalorder %s562_s27, %s555_s20 }
  0x27   : > { %p559_p11 = pneg %p558_p4  ;;  %p565_p7 = por %p564_p6, %p563_p9 }
  0x29   : > { %p566_p10 = pnand %p565_p7, %p559_p11 }
  0x2b   : > { %569 = shalt.err (!%p566_p10)
}
  0x2c   : > { %s655_s29 = smov 32   ;;  %s656_s30 = smov 2  }
  0x2d   : > { %472 = dma.hbm_to_vmem [thread:$0]  (!%p744_p0), %s751_s3, 96, %s753_s5, %s756_s6, %s655_s29, %s655_s29, %s656_s30  }
  0x2e   : > { %p175_p12 = scmp.lt.s32.totalorder %s652_s14, 3  ;;  %p902_p1 = scmp.ge.s32.totalorder %s652_s14, 1 }
  0x30   : > { %p176_p3 = pnand %p902_p1, %p175_p12 }
  0x31   : > { %s788_s4 = sand.u32 (!%p176_p3), 1, %s636_s10  }
  0x32   : > { %179 = sbr.rel (%p176_p3) target bundleno = 125 (0x7d), region = 28  ;;  %s182_s8 = scalar_lea.sflag (!%p176_p3), [#allocation3], %s788_s4 }
  0x33   : > { %s462_s7 = smul.u32 (!%p176_p3), 6, %s788_s4 }
  0x35   : > { %s185_s15 = scalar_lea.vmem (!%p176_p3), [#allocation2], %s462_s7 }
  0x39   : > { %623 = dma.done.wait (%p723_p8), %s182_s8, 96  }
  0x3a   : > { %625 = vsyncadd (%p723_p8), %s182_s8, 4294967200  ;;  %s463_s28 = smul.u32 18, %s788_s4  ;;  %p215_p9 = scmp.lt.s32.totalorder %s644_s12, 1  ;;  %v657_v0 = vmov 0.0   ;;  %vm240_vm0 = vcmask 1041408  }
  0x3b   : > { %v235_v1 = vld [vmem:[%s185_s15] sm:$0x3]  ;;  %v236_v2 = vld [vmem:[%s185_s15 + $0x2] sm:$0x3]  ;;  %v237_v3 = vld [vmem:[%s185_s15 + $0x4] sm:$0x3] }
  0x3c   : > { %s798_s3 = scalar_lea.vmem [#allocation5], %s463_s28  ;;  %v241_v5 = vsel %vm240_vm0, %v235_v1, -inf  ;;  %v242_v6 = vsel %vm240_vm0, %v236_v2, -inf  ;;  %v243_v7 = vsel %vm240_vm0, %v237_v3, -inf  ;;  %s464_s18 = smul.u32 288, %s644_s12 }
  0x3d   : > { %226 = vst [vmem:[%s798_s3] sm:$0x3] %v657_v0  ;;  %227 = vst [vmem:[%s798_s3 + $0x2] sm:$0x3] %v657_v0  ;;  %s216_s21 = scalar_select %p215_p9, %s644_s12, 1  ;;  %v244_v9 = vmax.f32 %v241_v5, %v242_v6 }
  0x3e   : > { %228 = vst [vmem:[%s798_s3 + $0x4] sm:$0x3] %v657_v0  ;;  %229 = vst [vmem:[%s798_s3 + $0x6] sm:$0x3] %v657_v0  ;;  %s330_s19 = sshll.u32 %s798_s3, 4  ;;  %s838_s25 = scalar_lea.hbm %s895_s2, %s464_s18  ;;  %s841_s19 = int_to_ptr.vmem [resolvable:$true] %s330_s19 }
  0x3f   : > { %230 = vst [vmem:[%s798_s3 + $0x8] sm:$0x3] %v657_v0  ;;  %231 = vst [vmem:[%s798_s3 + $0xa] sm:$0x3] %v657_v0  ;;  %s220_s16 = scalar_lea.vmem %s894_s1, %s216_s21  ;;  %v245_v11 = vmax.f32 %v244_v9, %v243_v7  ;;  %s315_s26 = scalar_lea.sflag [#allocation4], %s788_s4 }
  0x40   : > { %232 = vst [vmem:[%s798_s3 + $0xc] sm:$0x3] %v657_v0  ;;  %233 = vst [vmem:[%s798_s3 + $0xe] sm:$0x3] %v657_v0  ;;  %v238_v4 = vld [vmem:[%s220_s16] sm:$0x1] }
  0x41   : > { %234 = vst [vmem:[%s798_s3 + $0x10] sm:$0x3] %v657_v0  ;;  %v239_v8 = vunpack.c.0.s8 %v238_v4  ;;  %v246_v15 = vsub.f32 %v235_v1, %v245_v11  ;;  %v247_v16 = vsub.f32 %v236_v2, %v245_v11  ;;  %v248_v17 = vsub.f32 %v237_v3, %v245_v11  ;;  %s570_s27 = scalar_lea.vmem %s841_s19, 288  ;;  %p903_p11 = scmp.ne.s32.totalorder %s899_s22, 0 }
  0x42   : > { %p571_p8 = scmp.ne.s32.totalorder %s841_s19, %s570_s27  ;;  %s658_s29 = smov [#allocation5]  }
  0x43   : > { %vm265_vm1 = vcmp.eq.s32.totalorder %v239_v8, 0  ;;  %vm281_vm2 = vcmp.eq.s32.totalorder %v239_v8, 1  ;;  %vm298_vm3 = vcmp.eq.s32.totalorder %v239_v8, 2  ;;  %v249_v22 = vmul.f32 1.442695, %v246_v15  ;;  %s574_s30 = sshll.u32 %s658_s29, 4  ;;  %s575_s30 = int_to_ptr.vmem [resolvable:$false] %s574_s30 }
  0x44   : > { %v438_v12 = vsel %vm265_vm1, 1.0, %v657_v0  ;;  %v443_v13 = vsel %vm281_vm2, 1.0, %v657_v0  ;;  %v450_v21 = vsel %vm298_vm3, 1.0, %v657_v0  ;;  %v251_v23 = vmul.f32 1.442695, %v247_v16  ;;  %p572_p0 = pnand %p571_p8, %p903_p11  ;;  %s576_s7 = scalar_lea.vmem %s575_s30, 576 }
  0x45   : > { %v253_v24 = vmul.f32 1.442695, %v248_v17  ;;  %532 = vpow2.f32 %v249_v22  ;;  %v439_v38 = vld [vmem:[%s798_s3 + $0x6] sm:$0x3]  ;;  %v268_v44 = vld [vmem:[%s798_s3] sm:$0x3]  ;;  %p577_p13 = scmp.lt.s32.totalorder %s841_s19, %s575_s30  ;;  %p578_p2 = scmp.lt.s32.totalorder %s576_s7, %s570_s27 }
  0x46   : > { %534 = vpow2.f32 %v251_v23  ;;  %v446_v39 = vld [vmem:[%s798_s3 + $0x8] sm:$0x3]  ;;  %v453_v43 = vld [vmem:[%s798_s3 + $0xa] sm:$0x3]  ;;  %v444_v45 = vld [vmem:[%s798_s3 + $0x2] sm:$0x3]  ;;  %p573_p5 = pneg %p572_p0 }
  0x47   : > { %v441_v10 = vld [vmem:[%s798_s3 + $0xc] sm:$0x3]  ;;  %v448_v14 = vld [vmem:[%s798_s3 + $0xe] sm:$0x3]  ;;  %536 = vpow2.f32 %v253_v24  ;;  %v451_v50 = vld [vmem:[%s798_s3 + $0x4] sm:$0x3]  ;;  %p579_p4 = por %p578_p2, %p577_p13 }
  0x48   : > { %v278_v18 = vadd.f32 %v441_v10, %v438_v12  ;;  %v455_v19 = vld [vmem:[%s798_s3 + $0x10] sm:$0x3]  ;;  %v295_v20 = vadd.f32 %v448_v14, %v443_v13 }
  0x49   : > { %v312_v25 = vadd.f32 %v455_v19, %v450_v21  ;;  %p580_p6 = pnand %p579_p4, %p573_p5 }
  0x4a   : > { %442 = vst [vmem:[%s798_s3 + $0xc] sm:$0x3] %v278_v18  ;;  %449 = vst [vmem:[%s798_s3 + $0xe] sm:$0x3] %v295_v20 }
  0x4b   : > { %456 = vst [vmem:[%s798_s3 + $0x10] sm:$0x3] %v312_v25 }
  0x4f   : > { %v533_v26 = vpop.eup %532 }
  0x50   : > { %v535_v27 = vpop.eup %534  ;;  %v255_v28 = vsel %vm240_vm0, %v533_v26, 0.0 }
  0x51   : > { %v537_v29 = vpop.eup %536  ;;  %v256_v30 = vsel %vm240_vm0, %v535_v27, 0.0 }
  0x52   : > { %v257_v31 = vadd.f32 %v256_v30, %v255_v28  ;;  %v258_v32 = vsel %vm240_vm0, %v537_v29, 0.0 }
  0x54   : > { %v259_v33 = vadd.f32 %v258_v32, %v257_v31 }
  0x56   : > { %538 = vrcp.f32 %v259_v33 }
  0x60   : > { %v539_v34 = vpop.eup %538 }
  0x61   : > { %v261_v35 = vmul.f32 %v539_v34, %v259_v33 }
  0x63   : > { %v262_v36 = vsub.f32 2.0, %v261_v35 }
  0x65   : > { %v263_v37 = vmul.f32 %v539_v34, %v262_v36 }
  0x67   : > { %v264_v40 = vmul.f32 %v533_v26, %v263_v37  ;;  %v280_v41 = vmul.f32 %v535_v27, %v263_v37  ;;  %v297_v42 = vmul.f32 %v537_v29, %v263_v37 }
  0x69   : > { %v269_v46 = vmul.f32 %v438_v12, %v264_v40  ;;  %v274_v47 = vadd.f32 %v439_v38, %v264_v40  ;;  %v286_v48 = vmul.f32 %v443_v13, %v280_v41  ;;  %v291_v49 = vadd.f32 %v446_v39, %v280_v41 }
  0x6a   : > { %v303_v51 = vmul.f32 %v450_v21, %v297_v42  ;;  %v308_v52 = vadd.f32 %v453_v43, %v297_v42 }
  0x6b   : > { %v270_v53 = vadd.f32 %v269_v46, %v268_v44  ;;  %440 = vst [vmem:[%s798_s3 + $0x6] sm:$0x3] %v274_v47  ;;  %v287_v54 = vadd.f32 %v444_v45, %v286_v48  ;;  %447 = vst [vmem:[%s798_s3 + $0x8] sm:$0x3] %v291_v49 }
  0x6c   : > { %v304_v55 = vadd.f32 %v451_v50, %v303_v51  ;;  %454 = vst [vmem:[%s798_s3 + $0xa] sm:$0x3] %v308_v52 }
  0x6d   : > { %271 = vst [vmem:[%s798_s3] sm:$0x3] %v270_v53  ;;  %445 = vst [vmem:[%s798_s3 + $0x2] sm:$0x3] %v287_v54 }
  0x6e   : > { %452 = vst [vmem:[%s798_s3 + $0x4] sm:$0x3] %v304_v55 }
  0x6f   : > { %583 = shalt.err (!%p580_p6)
}
  0x70   : > { %s584_s8 = scalar_lea.hbm %s838_s25, 288  ;;  %s588_s3 = scalar_lea.hbm %s895_s2, 576 }
  0x71   : > { %p585_p7 = scmp.ne.s32.totalorder %s838_s25, %s584_s8  ;;  %p589_p1 = scmp.lt.u32.totalorder %s838_s25, %s895_s2 }
  0x72   : > { %p590_p3 = scmp.lt.u32.totalorder %s588_s3, %s584_s8  ;;  %p592_p8 = scmp.lt.u32.totalorder %s584_s8, %s838_s25 }
  0x73   : > { %p586_p10 = pnand %p585_p7, %p903_p11 }
  0x74   : > { %p591_p9 = por %p590_p3, %p589_p1 }
  0x75   : > { %p587_p12 = pneg %p586_p10 }
  0x76   : > { %p593_p0 = por %p592_p8, %p591_p9 }
  0x78   : > { %p594_p5 = pnand %p593_p0, %p587_p12 }
  0x7a   : > { %597 = shalt.err (!%p594_p5)
}
  0x7b   : > { %s659_s6 = smov 32   ;;  %s660_s16 = smov 2  }
  0x7c   : > { %467 = dma.vmem_to_hbm [thread:$0]  (%p903_p11), %s841_s19, 288, %s838_s25, %s315_s26, %s659_s6, %s659_s6, %s660_s16  }
  0x7d PF: > { %s345_s18 = sand.u32 1, %s632_s9   ;;  %p904_p13 = scmp.ne.s32.totalorder %s900_s24, 0 }
  0x7e   : > { %p905_p2 = scmp.ge.s32.totalorder %s652_s14, 2  ;;  %s346_s12 = scalar_lea.sflag [#allocation4], %s345_s18 }
  0x80   : > { %p474_p4 = pnand %p905_p2, %p904_p13 }
  0x82   : > { %627 = dma.done.wait (!%p474_p4), %s346_s12, 288  }
  0x83   : > { %629 = vsyncadd (!%p474_p4), %s346_s12, 4294967008  ;;  %s18_s14 = sadd.s32 1, %s652_s14   ;;  %s906_s9 = smov %s636_s10 }
  0x84   : > { %p15_p6 = scmp.ge.s32.totalorder %s18_s14, 4   ;;  %s907_s10 = smov %s640_s11 }
  0x85   : > { %s908_s11 = smov %s732_s23  ;;  %s909_s12 = smov %s648_s13 }
  0x86   : > { %s910_s13 = smov %s912_s17  ;;  %17 = sbr.rel (!%p15_p6) target bundleno = 6 (0x6), region = 88 }
  0x8d   :  { %351 = vsyncpa [#allocation3], 1 }
  0x8e   :  { %353 = vsyncpa [#allocation3 + $0x1], 1 }
  0x8f   :  { %354 = vsyncpa [#allocation4], 1 }
  0x90   :  { %356 = vsyncpa [#allocation4 + $0x1], 1 }

</bundles_post_ra>
